<compile_context>
chip_gen: v6e
topology: v6e:2x2x1
jax: 0.10.0
libtpu: 0.0.40
codegen_flags: <defaults>
</compile_context>

<pallas_src>
import functools

import jax
import jax.numpy as jnp
import numpy as np
from jax.experimental import pallas as pl
from jax.experimental.pallas import tpu as pltpu

H1, H2 = 400, 300          # PyTorch hidden widths
H1P, H2P = 512, 384        # lane-aligned (multiple-of-128) padded widths
OUT_PAD = 128              # lane-dense output slab; sliced to action_dim outside
LANE = 128


def _round_up(n, m):
    return ((n + m - 1) // m) * m


def actor_mlp_kernel(x_ref, w1_ref, b1_ref, w2_ref, b2_ref, w3_ref, b3_ref, o_ref):
    # One batch tile per grid step; all weights resident in VMEM.
    x = x_ref[...]

    h1 = jnp.dot(x, w1_ref[...], preferred_element_type=jnp.float32) + b1_ref[...]
    h1 = jnp.maximum(h1, 0.0)                       # ReLU (padded cols stay 0)

    h2 = jnp.dot(h1, w2_ref[...], preferred_element_type=jnp.float32) + b2_ref[...]
    h2 = jnp.maximum(h2, 0.0)                       # ReLU (padded cols stay 0)

    out = jnp.dot(h2, w3_ref[...], preferred_element_type=jnp.float32) + b3_ref[...]
    o_ref[...] = jnp.tanh(out).astype(o_ref.dtype)  # tanh; padded cols -> tanh(0)=0


def pad_params(params):
    """Zero-pad all parameter lane/contraction dims to multiples of 128.

    Call once (outside the training/inference loop); the padded params are
    what `actor_forward` consumes. Returns (padded_params, action_dim).
    """
    w1, b1, w2, b2, w3, b3 = params
    state_dim = w1.shape[0]
    action_dim = w3.shape[1]
    sp = _round_up(max(state_dim, 1), LANE)

    w1p = jnp.pad(w1, ((0, sp - state_dim), (0, H1P - H1)))
    b1p = jnp.pad(b1, ((0, 0), (0, H1P - H1)))
    w2p = jnp.pad(w2, ((0, H1P - H1), (0, H2P - H2)))
    b2p = jnp.pad(b2, ((0, 0), (0, H2P - H2)))
    w3p = jnp.pad(w3, ((0, H2P - H2), (0, OUT_PAD - action_dim)))
    b3p = jnp.pad(b3, ((0, 0), (0, OUT_PAD - action_dim)))
    return (w1p, b1p, w2p, b2p, w3p, b3p), action_dim


@functools.partial(jax.jit, static_argnames=("action_dim",))
def actor_forward(x, padded_params, *, action_dim):
    """x: (B, state_dim) float32 -> (B, action_dim) float32."""
    w1p, b1p, w2p, b2p, w3p, b3p = padded_params
    B, state_dim = x.shape
    sp = w1p.shape[0]                       # lane-aligned state width

    # Batch tiling: pad rows so every block is full (no partial-block masking),
    # pad state cols to the lane-aligned width (matching zero weight rows).
    # TM=256 keeps per-step VMEM (x/out tiles + f32 h1/h2 temporaries + the
    # ~1.2 MiB resident weights) far below even v7x's 64 MiB budget while
    # amortizing the ~0.35 us per-grid-step overhead.
    B8 = _round_up(B, 8)
    TM = min(256, B8)
    B_pad = _round_up(B8, TM)
    xp = jnp.pad(x, ((0, B_pad - B), (0, sp - state_dim)))

    out = pl.pallas_call(
        actor_mlp_kernel,
        out_shape=jax.ShapeDtypeStruct((B_pad, OUT_PAD), jnp.float32),
        grid=(B_pad // TM,),
        in_specs=[
            pl.BlockSpec((TM, sp), lambda i: (i, 0)),     # x: tiled over batch
            pl.BlockSpec((sp, H1P), lambda i: (0, 0)),    # weights/biases: resident
            pl.BlockSpec((1, H1P), lambda i: (0, 0)),
            pl.BlockSpec((H1P, H2P), lambda i: (0, 0)),
            pl.BlockSpec((1, H2P), lambda i: (0, 0)),
            pl.BlockSpec((H2P, OUT_PAD), lambda i: (0, 0)),
            pl.BlockSpec((1, OUT_PAD), lambda i: (0, 0)),
        ],
        out_specs=pl.BlockSpec((TM, OUT_PAD), lambda i: (i, 0)),
        compiler_params=pltpu.CompilerParams(
            dimension_semantics=("parallel",),
        ),
    )(xp, w1p, b1p, w2p, b2p, w3p, b3p)

    return out[:B, :action_dim]


def init_params(key, state_dim, action_dim, init_w=0.003):
    """Mirror ActorModel.init_weights.

    fc1/fc2 weights: uniform(-1/sqrt(fan_in), 1/sqrt(fan_in));
    fc3 weight: uniform(-init_w, init_w);
    biases keep PyTorch's default nn.Linear init
    (uniform(-1/sqrt(fan_in), 1/sqrt(fan_in))) since init_weights doesn't
    override them.
    """
    ks = jax.random.split(key, 6)

    def u(k, shape, bound):
        return jax.random.uniform(k, shape, jnp.float32, -bound, bound)

    b_fc1 = 1.0 / np.sqrt(state_dim)
    b_fc2 = 1.0 / np.sqrt(H1)
    b_fc3_bias = 1.0 / np.sqrt(H2)

    w1 = u(ks[0], (state_dim, H1), b_fc1)       # stored (in, out)
    b1 = u(ks[1], (1, H1), b_fc1)
    w2 = u(ks[2], (H1, H2), b_fc2)
    b2 = u(ks[3], (1, H2), b_fc2)
    w3 = u(ks[4], (H2, action_dim), init_w)
    b3 = u(ks[5], (1, action_dim), b_fc3_bias)
    return (w1, b1, w2, b2, w3, b3)


def reference_forward(x, params):
    """Plain-JAX reference with identical semantics to ActorModel.forward."""
    w1, b1, w2, b2, w3, b3 = params
    h1 = jnp.maximum(x @ w1 + b1, 0.0)
    h2 = jnp.maximum(h1 @ w2 + b2, 0.0)
    return jnp.tanh(h2 @ w3 + b3)


if __name__ == "__main__":
    key = jax.random.PRNGKey(0)
    k_x, k_x2, k_p = jax.random.split(key, 3)

    batch, state_dim, action_dim = 2, 32, 4   # state_shape=(32,), action_shape=(4,)
    params = init_params(k_p, state_dim, action_dim, init_w=0.003)
    padded_params, adim = pad_params(params)

    # Small case (single grid step).
    x = jax.random.normal(k_x, (batch, state_dim), jnp.float32)
    out = jax.block_until_ready(actor_forward(x, padded_params, action_dim=adim))
    ref = reference_forward(x, params)
    assert out.shape == (batch, action_dim), out.shape
    np.testing.assert_allclose(np.asarray(out), np.asarray(ref), rtol=1e-5, atol=1e-5)

    # Larger case exercising batch padding and a multi-step grid.
    x2 = jax.random.normal(k_x2, (300, state_dim), jnp.float32)
    out2 = jax.block_until_ready(actor_forward(x2, padded_params, action_dim=adim))
    ref2 = reference_forward(x2, params)
    assert out2.shape == (300, action_dim), out2.shape
    np.testing.assert_allclose(np.asarray(out2), np.asarray(ref2), rtol=1e-5, atol=1e-5)

    print("KERNEL_OK")
</pallas_src>

<mosaic_0001>
module attributes {stable_mosaic.version = 11 : i64} {
  func.func @actor_mlp_kernel(%arg0: i32, %arg1: memref<8x128xf32, #tpu.memory_space<vmem>>, %arg2: memref<128x512xf32, #tpu.memory_space<vmem>>, %arg3: memref<1x512xf32, #tpu.memory_space<vmem>>, %arg4: memref<512x384xf32, #tpu.memory_space<vmem>>, %arg5: memref<1x384xf32, #tpu.memory_space<vmem>>, %arg6: memref<384x128xf32, #tpu.memory_space<vmem>>, %arg7: memref<1x128xf32, #tpu.memory_space<vmem>>, %arg8: memref<8x128xf32, #tpu.memory_space<vmem>>) attributes {dimension_semantics = [#tpu.dimension_semantics<parallel>], iteration_bounds = array<i64: 1>, scalar_prefetch = 0 : i64, scratch_operands = 0 : i64, tpu.core_type = #tpu.core_type<tc>, window_params = [{transform_indices = @transform_0, window_bounds = array<i64: 8, 128>}, {pipeline_mode = #tpu.pipeline_mode<synchronous>, transform_indices = @transform_1, window_bounds = array<i64: 128, 512>}, {pipeline_mode = #tpu.pipeline_mode<synchronous>, transform_indices = @transform_2, window_bounds = array<i64: 1, 512>}, {pipeline_mode = #tpu.pipeline_mode<synchronous>, transform_indices = @transform_3, window_bounds = array<i64: 512, 384>}, {pipeline_mode = #tpu.pipeline_mode<synchronous>, transform_indices = @transform_4, window_bounds = array<i64: 1, 384>}, {pipeline_mode = #tpu.pipeline_mode<synchronous>, transform_indices = @transform_5, window_bounds = array<i64: 384, 128>}, {pipeline_mode = #tpu.pipeline_mode<synchronous>, transform_indices = @transform_6, window_bounds = array<i64: 1, 128>}, {transform_indices = @transform_7, window_bounds = array<i64: 8, 128>}]} {
    %c0 = arith.constant 0 : index
    %c0_0 = arith.constant 0 : index
    %0 = vector.load %arg1[%c0, %c0_0] : memref<8x128xf32, #tpu.memory_space<vmem>>, vector<8x128xf32>
    %c0_1 = arith.constant 0 : index
    %c0_2 = arith.constant 0 : index
    %1 = vector.load %arg2[%c0_1, %c0_2] : memref<128x512xf32, #tpu.memory_space<vmem>>, vector<128x512xf32>
    %cst = arith.constant dense<0.000000e+00> : vector<8x512xf32>
    %2 = tpu.matmul %0, %1, %cst {dimension_numbers = #tpu.dot_dimension_numbers<[1], [0], [0], [1], [0, 0, 1, 1], [], []>} : vector<8x128xf32>, vector<128x512xf32>, vector<8x512xf32> -> vector<8x512xf32>
    %c0_3 = arith.constant 0 : index
    %c0_4 = arith.constant 0 : index
    %3 = vector.load %arg3[%c0_3, %c0_4] : memref<1x512xf32, #tpu.memory_space<vmem>>, vector<1x512xf32>
    %4 = vector.broadcast %3 : vector<1x512xf32> to vector<8x512xf32>
    %5 = arith.addf %2, %4 : vector<8x512xf32>
    %cst_5 = arith.constant 0.000000e+00 : f32
    %6 = vector.broadcast %cst_5 : f32 to vector<8x512xf32>
    %7 = arith.maximumf %5, %6 : vector<8x512xf32>
    %c0_6 = arith.constant 0 : index
    %c0_7 = arith.constant 0 : index
    %8 = vector.load %arg4[%c0_6, %c0_7] : memref<512x384xf32, #tpu.memory_space<vmem>>, vector<512x384xf32>
    %cst_8 = arith.constant dense<0.000000e+00> : vector<8x384xf32>
    %9 = tpu.matmul %7, %8, %cst_8 {dimension_numbers = #tpu.dot_dimension_numbers<[1], [0], [0], [1], [0, 0, 1, 1], [], []>} : vector<8x512xf32>, vector<512x384xf32>, vector<8x384xf32> -> vector<8x384xf32>
    %c0_9 = arith.constant 0 : index
    %c0_10 = arith.constant 0 : index
    %10 = vector.load %arg5[%c0_9, %c0_10] : memref<1x384xf32, #tpu.memory_space<vmem>>, vector<1x384xf32>
    %11 = vector.broadcast %10 : vector<1x384xf32> to vector<8x384xf32>
    %12 = arith.addf %9, %11 : vector<8x384xf32>
    %cst_11 = arith.constant 0.000000e+00 : f32
    %13 = vector.broadcast %cst_11 : f32 to vector<8x384xf32>
    %14 = arith.maximumf %12, %13 : vector<8x384xf32>
    %c0_12 = arith.constant 0 : index
    %c0_13 = arith.constant 0 : index
    %15 = vector.load %arg6[%c0_12, %c0_13] : memref<384x128xf32, #tpu.memory_space<vmem>>, vector<384x128xf32>
    %cst_14 = arith.constant dense<0.000000e+00> : vector<8x128xf32>
    %16 = tpu.matmul %14, %15, %cst_14 {dimension_numbers = #tpu.dot_dimension_numbers<[1], [0], [0], [1], [0, 0, 1, 1], [], []>} : vector<8x384xf32>, vector<384x128xf32>, vector<8x128xf32> -> vector<8x128xf32>
    %c0_15 = arith.constant 0 : index
    %c0_16 = arith.constant 0 : index
    %17 = vector.load %arg7[%c0_15, %c0_16] : memref<1x128xf32, #tpu.memory_space<vmem>>, vector<1x128xf32>
    %18 = vector.broadcast %17 : vector<1x128xf32> to vector<8x128xf32>
    %19 = arith.addf %16, %18 : vector<8x128xf32>
    %20 = math.tanh %19 : vector<8x128xf32>
    %c0_17 = arith.constant 0 : index
    %c0_18 = arith.constant 0 : index
    %21 = vector.load %arg8[%c0_17, %c0_18] : memref<8x128xf32, #tpu.memory_space<vmem>>, vector<8x128xf32>
    tpu.vector_store %arg8[%c0_17, %c0_18], %20 {strides = array<i32>} : memref<8x128xf32, #tpu.memory_space<vmem>>, vector<8x128xf32>,
    return
  }
  func.func @transform_0(%arg0: i32) -> (i32, i32) {
    %c0_i32 = arith.constant 0 : i32
    %c0_i32_0 = arith.constant 0 : i32
    return %arg0, %c0_i32 : i32, i32
  }
  func.func @transform_1(%arg0: i32) -> (i32, i32) {
    %c0_i32 = arith.constant 0 : i32
    %c0_i32_0 = arith.constant 0 : i32
    %c0_i32_1 = arith.constant 0 : i32
    return %c0_i32, %c0_i32_0 : i32, i32
  }
  func.func @transform_2(%arg0: i32) -> (i32, i32) {
    %c0_i32 = arith.constant 0 : i32
    %c0_i32_0 = arith.constant 0 : i32
    %c0_i32_1 = arith.constant 0 : i32
    return %c0_i32, %c0_i32_0 : i32, i32
  }
  func.func @transform_3(%arg0: i32) -> (i32, i32) {
    %c0_i32 = arith.constant 0 : i32
    %c0_i32_0 = arith.constant 0 : i32
    %c0_i32_1 = arith.constant 0 : i32
    return %c0_i32, %c0_i32_0 : i32, i32
  }
  func.func @transform_4(%arg0: i32) -> (i32, i32) {
    %c0_i32 = arith.constant 0 : i32
    %c0_i32_0 = arith.constant 0 : i32
    %c0_i32_1 = arith.constant 0 : i32
    return %c0_i32, %c0_i32_0 : i32, i32
  }
  func.func @transform_5(%arg0: i32) -> (i32, i32) {
    %c0_i32 = arith.constant 0 : i32
    %c0_i32_0 = arith.constant 0 : i32
    %c0_i32_1 = arith.constant 0 : i32
    return %c0_i32, %c0_i32_0 : i32, i32
  }
  func.func @transform_6(%arg0: i32) -> (i32, i32) {
    %c0_i32 = arith.constant 0 : i32
    %c0_i32_0 = arith.constant 0 : i32
    %c0_i32_1 = arith.constant 0 : i32
    return %c0_i32, %c0_i32_0 : i32, i32
  }
  func.func @transform_7(%arg0: i32) -> (i32, i32) {
    %c0_i32 = arith.constant 0 : i32
    %c0_i32_0 = arith.constant 0 : i32
    return %arg0, %c0_i32 : i32, i32
  }
}

</mosaic_0001>

<bundles_post_ra>
// kernel: actor_forward.1
= control target key start
LH: loop header
LB: loop body
LE: loop exit
PB: predicated region body
PF: predicated region fallthrough
CT: control target
= control target key end

     0   :  { %12 = vsyncpa [#allocation3], 0  ;;  %s1358_s0 = inlined_call_operand.vmem [shape: f32[8,128], index: 0, kind: input, shape index: {}]   ;;  %s1359_s1 = inlined_call_operand.hbm [shape: f32[128,512], index: 1, kind: input, shape index: {}]   ;;  %s1360_s2 = inlined_call_operand.vmem [shape: f32[1,512], index: 2, kind: input, shape index: {}]   ;;  %s1361_s3 = inlined_call_operand.hbm [shape: f32[512,384], index: 3, kind: input, shape index: {}]   ;;  %s1362_s4 = inlined_call_operand.vmem [shape: f32[1,384], index: 4, kind: input, shape index: {}]   ;;  %s1363_s5 = inlined_call_operand.hbm [shape: f32[384,128], index: 5, kind: input, shape index: {}]   ;;  %s1364_s6 = inlined_call_operand.vmem [shape: f32[1,128], index: 6, kind: input, shape index: {}]   ;;  %s1365_s7 = inlined_call_operand.vmem [shape: f32[8,128], index: 7, kind: output, shape index: {}]  }
   0x1   :  { %13 = vsyncpa [#allocation5], 0  ;;  %s1232_s24 = smov [#allocation4]  }
   0x2   :  { %s35_s25 = sshll.u32 %s1232_s24, 4  ;;  %s36_s25 = int_to_ptr.vmem [resolvable:$true] %s35_s25 }
   0x3   :  { %s1176_s26 = scalar_lea.vmem %s36_s25, 24576  ;;  %p1181_p1 = scmp.lt.s32.totalorder %s36_s25, %s36_s25 }
   0x4   :  { %p1177_p0 = scmp.ne.s32.totalorder %s36_s25, %s1176_s26  ;;  %p1182_p2 = scmp.lt.s32.totalorder %s1176_s26, %s1176_s26 }
   0x6   :  { %p1183_p3 = por %p1182_p2, %p1181_p1 }
   0x8   :  { %p1184_p4 = pnand %p1183_p3, %p1177_p0 }
   0xa   :  { %1187 = shalt.err (!%p1184_p4)
}
   0xb   :  { %s1233_s27 = smov 384   ;;  %s1234_s28 = smov 24  }
   0xc   :  { %41 = dma.hbm_to_vmem [thread:$0]  %s1361_s3, 24576, %s36_s25, [#allocation5], %s1233_s27, %s1233_s27, %s1234_s28  }
   0xd   :  { %s1235_s8 = smov [#allocation2]  }
   0xe   :  { %s21_s9 = sshll.u32 %s1235_s8, 4  ;;  %s22_s9 = int_to_ptr.vmem [resolvable:$true] %s21_s9 }
   0xf   :  { %s1196_s10 = scalar_lea.vmem %s22_s9, 8192  ;;  %p1201_p6 = scmp.lt.s32.totalorder %s22_s9, %s22_s9 }
  0x10   :  { %p1197_p5 = scmp.ne.s32.totalorder %s22_s9, %s1196_s10  ;;  %p1202_p7 = scmp.lt.s32.totalorder %s1196_s10, %s1196_s10 }
  0x12   :  { %p1203_p8 = por %p1202_p7, %p1201_p6 }
  0x14   :  { %p1204_p9 = pnand %p1203_p8, %p1197_p5 }
  0x16   :  { %1207 = shalt.err (!%p1204_p9)
}
  0x17   :  { %s1236_s11 = smov 512   ;;  %s1237_s12 = smov 32  }
  0x18   :  { %27 = dma.hbm_to_vmem [thread:$0]  %s1359_s1, 8192, %s22_s9, [#allocation3], %s1236_s11, %s1236_s11, %s1237_s12  }
  0x19   :  { %s1238_s15 = smov [#allocation6]  }
  0x1a   :  { %s49_s16 = sshll.u32 %s1238_s15, 4  ;;  %s50_s16 = int_to_ptr.vmem [resolvable:$true] %s49_s16 }
  0x1b   :  { %s1216_s3 = scalar_lea.vmem %s50_s16, 6144  ;;  %p1221_p11 = scmp.lt.s32.totalorder %s50_s16, %s50_s16 }
  0x1c   :  { %p1217_p10 = scmp.ne.s32.totalorder %s50_s16, %s1216_s3  ;;  %p1222_p12 = scmp.lt.s32.totalorder %s1216_s3, %s1216_s3 }
  0x1e   :  { %p1223_p13 = por %p1222_p12, %p1221_p11 }
  0x20   :  { %p1224_p0 = pnand %p1223_p13, %p1217_p10 }
  0x22   :  { %1227 = shalt.err (!%p1224_p0)
}
  0x23   :  { %s1239_s17 = smov 128   ;;  %s1240_s18 = smov 8  }
  0x24   :  { %55 = dma.hbm_to_vmem [thread:$0]  %s1363_s5, 6144, %s50_s16, [#allocation5], %s1239_s17, %s1239_s17, %s1240_s18  }
  0x25   :  { %1228 = dma.done.wait [#allocation3], 8192  }
  0x26   :  { %1229 = vsyncadd [#allocation3], 4294959104 }
  0x27   :  { %1230 = dma.done.wait [#allocation5], 30720  }
  0x28   :  { %1231 = vsyncadd [#allocation5], 4294936576  ;;  %v1241_v0 = vmov 0.0   ;;  %v129_v1 = vld [vmem:[#allocation2 + $0x1e8] sm:$0xff]  ;;  %v131_v2 = vld [vmem:[#allocation2 + $0x1f8] sm:$0xff]  ;;  %vm1242_vm0 = vmmov 0  }
  0x29   :  { %218 = vmatprep.mubr.f32.mxu0 %v1241_v0  ;;  %289 = vmatprep.mubr.f32.mxu1 %v1241_v0  ;;  %v128_v3 = vld [vmem:[#allocation2 + $0x1e0] sm:$0xff]  ;;  %v130_v4 = vld [vmem:[#allocation2 + $0x1f0] sm:$0xff]  ;;  %v125_v5 = vld [vmem:[#allocation2 + $0x1c8] sm:$0xff] }
  0x2a   :  { %154 = vmatprep.subr.mxu0 %v129_v1  ;;  %225 = vmatprep.subr.mxu1 %v131_v2  ;;  %v127_v6 = vld [vmem:[#allocation2 + $0x1d8] sm:$0xff]  ;;  %v124_v7 = vld [vmem:[#allocation2 + $0x1c0] sm:$0xff]  ;;  %v126_v8 = vld [vmem:[#allocation2 + $0x1d0] sm:$0xff] }
  0x2b   :  { %155 = vmatpush1.msra.mxu0 %v128_v3  ;;  %226 = vmatpush1.msra.mxu1 %v130_v4  ;;  %v121_v9 = vld [vmem:[#allocation2 + $0x1a8] sm:$0xff]  ;;  %v123_v10 = vld [vmem:[#allocation2 + $0x1b8] sm:$0xff]  ;;  %v120_v11 = vld [vmem:[#allocation2 + $0x1a0] sm:$0xff] }
  0x2c   :  { %156 = vmatprep.subr.mxu0 %v125_v5  ;;  %227 = vmatprep.subr.mxu1 %v127_v6  ;;  %v122_v12 = vld [vmem:[#allocation2 + $0x1b0] sm:$0xff]  ;;  %v117_v13 = vld [vmem:[#allocation2 + $0x188] sm:$0xff]  ;;  %v119_v14 = vld [vmem:[#allocation2 + $0x198] sm:$0xff] }
  0x2d   :  { %157 = vmatpush1.msra.mxu0 %v124_v7  ;;  %228 = vmatpush1.msra.mxu1 %v126_v8  ;;  %v116_v15 = vld [vmem:[#allocation2 + $0x180] sm:$0xff]  ;;  %v118_v16 = vld [vmem:[#allocation2 + $0x190] sm:$0xff]  ;;  %v113_v17 = vld [vmem:[#allocation2 + $0x168] sm:$0xff] }
  0x2e   :  { %158 = vmatprep.subr.mxu0 %v121_v9  ;;  %229 = vmatprep.subr.mxu1 %v123_v10  ;;  %v115_v18 = vld [vmem:[#allocation2 + $0x178] sm:$0xff]  ;;  %v112_v19 = vld [vmem:[#allocation2 + $0x160] sm:$0xff]  ;;  %v114_v20 = vld [vmem:[#allocation2 + $0x170] sm:$0xff] }
  0x2f   :  { %159 = vmatpush1.msra.mxu0 %v120_v11  ;;  %230 = vmatpush1.msra.mxu1 %v122_v12  ;;  %v109_v21 = vld [vmem:[#allocation2 + $0x148] sm:$0xff]  ;;  %v111_v22 = vld [vmem:[#allocation2 + $0x158] sm:$0xff]  ;;  %v108_v23 = vld [vmem:[#allocation2 + $0x140] sm:$0xff] }
  0x30   :  { %160 = vmatprep.subr.mxu0 %v117_v13  ;;  %231 = vmatprep.subr.mxu1 %v119_v14  ;;  %v110_v24 = vld [vmem:[#allocation2 + $0x150] sm:$0xff]  ;;  %v105_v25 = vld [vmem:[#allocation2 + $0x128] sm:$0xff]  ;;  %v107_v26 = vld [vmem:[#allocation2 + $0x138] sm:$0xff] }
  0x31   :  { %161 = vmatpush1.msra.mxu0 %v116_v15  ;;  %232 = vmatpush1.msra.mxu1 %v118_v16  ;;  %v104_v27 = vld [vmem:[#allocation2 + $0x120] sm:$0xff]  ;;  %v106_v28 = vld [vmem:[#allocation2 + $0x130] sm:$0xff]  ;;  %v101_v29 = vld [vmem:[#allocation2 + $0x108] sm:$0xff] }
  0x32   :  { %162 = vmatprep.subr.mxu0 %v113_v17  ;;  %233 = vmatprep.subr.mxu1 %v115_v18  ;;  %v103_v30 = vld [vmem:[#allocation2 + $0x118] sm:$0xff]  ;;  %v100_v31 = vld [vmem:[#allocation2 + $0x100] sm:$0xff]  ;;  %v102_v32 = vld [vmem:[#allocation2 + $0x110] sm:$0xff] }
  0x33   :  { %163 = vmatpush1.msra.mxu0 %v112_v19  ;;  %234 = vmatpush1.msra.mxu1 %v114_v20  ;;  %v97_v33 = vld [vmem:[#allocation2 + $0xe8] sm:$0xff]  ;;  %v99_v34 = vld [vmem:[#allocation2 + $0xf8] sm:$0xff]  ;;  %v96_v35 = vld [vmem:[#allocation2 + $0xe0] sm:$0xff] }
  0x34   :  { %164 = vmatprep.subr.mxu0 %v109_v21  ;;  %235 = vmatprep.subr.mxu1 %v111_v22  ;;  %v98_v36 = vld [vmem:[#allocation2 + $0xf0] sm:$0xff]  ;;  %v93_v37 = vld [vmem:[#allocation2 + $0xc8] sm:$0xff]  ;;  %v95_v38 = vld [vmem:[#allocation2 + $0xd8] sm:$0xff] }
  0x35   :  { %165 = vmatpush1.msra.mxu0 %v108_v23  ;;  %236 = vmatpush1.msra.mxu1 %v110_v24  ;;  %v92_v39 = vld [vmem:[#allocation2 + $0xc0] sm:$0xff]  ;;  %v94_v40 = vld [vmem:[#allocation2 + $0xd0] sm:$0xff]  ;;  %v89_v41 = vld [vmem:[#allocation2 + $0xa8] sm:$0xff] }
  0x36   :  { %166 = vmatprep.subr.mxu0 %v105_v25  ;;  %237 = vmatprep.subr.mxu1 %v107_v26  ;;  %v91_v42 = vld [vmem:[#allocation2 + $0xb8] sm:$0xff]  ;;  %v88_v43 = vld [vmem:[#allocation2 + $0xa0] sm:$0xff]  ;;  %v90_v44 = vld [vmem:[#allocation2 + $0xb0] sm:$0xff] }
  0x37   :  { %167 = vmatpush1.msra.mxu0 %v104_v27  ;;  %238 = vmatpush1.msra.mxu1 %v106_v28  ;;  %v85_v45 = vld [vmem:[#allocation2 + $0x88] sm:$0xff]  ;;  %v87_v46 = vld [vmem:[#allocation2 + $0x98] sm:$0xff]  ;;  %v84_v47 = vld [vmem:[#allocation2 + $0x80] sm:$0xff] }
  0x38   :  { %168 = vmatprep.subr.mxu0 %v101_v29  ;;  %239 = vmatprep.subr.mxu1 %v103_v30  ;;  %v86_v48 = vld [vmem:[#allocation2 + $0x90] sm:$0xff]  ;;  %v81_v49 = vld [vmem:[#allocation2 + $0x68] sm:$0xff]  ;;  %v83_v50 = vld [vmem:[#allocation2 + $0x78] sm:$0xff] }
  0x39   :  { %169 = vmatpush1.msra.mxu0 %v100_v31  ;;  %240 = vmatpush1.msra.mxu1 %v102_v32  ;;  %v80_v51 = vld [vmem:[#allocation2 + $0x60] sm:$0xff]  ;;  %v82_v52 = vld [vmem:[#allocation2 + $0x70] sm:$0xff]  ;;  %v77_v53 = vld [vmem:[#allocation2 + $0x48] sm:$0xff] }
  0x3a   :  { %170 = vmatprep.subr.mxu0 %v97_v33  ;;  %241 = vmatprep.subr.mxu1 %v99_v34  ;;  %v79_v54 = vld [vmem:[#allocation2 + $0x58] sm:$0xff]  ;;  %v76_v55 = vld [vmem:[#allocation2 + $0x40] sm:$0xff]  ;;  %v78_v56 = vld [vmem:[#allocation2 + $0x50] sm:$0xff] }
  0x3b   :  { %171 = vmatpush1.msra.mxu0 %v96_v35  ;;  %242 = vmatpush1.msra.mxu1 %v98_v36  ;;  %v73_v57 = vld [vmem:[#allocation2 + $0x28] sm:$0xff]  ;;  %v75_v58 = vld [vmem:[#allocation2 + $0x38] sm:$0xff]  ;;  %v72_v59 = vld [vmem:[#allocation2 + $0x20] sm:$0xff] }
  0x3c   :  { %172 = vmatprep.subr.mxu0 %v93_v37  ;;  %243 = vmatprep.subr.mxu1 %v95_v38  ;;  %v74_v60 = vld [vmem:[#allocation2 + $0x30] sm:$0xff]  ;;  %v69_v61 = vld [vmem:[#allocation2 + $0x8] sm:$0xff]  ;;  %v71_v62 = vld [vmem:[#allocation2 + $0x18] sm:$0xff] }
  0x3d   :  { %173 = vmatpush1.msra.mxu0 %v92_v39  ;;  %244 = vmatpush1.msra.mxu1 %v94_v40  ;;  %v68_v63 = vld [vmem:[#allocation2] sm:$0xff]  ;;  %v70_v1 = vld [vmem:[#allocation2 + $0x10] sm:$0xff]  ;;  %v345_v5 = vld [vmem:[#allocation4 + $0x168] sm:$0xff] }
  0x3e   :  { %174 = vmatprep.subr.mxu0 %v89_v41  ;;  %245 = vmatprep.subr.mxu1 %v91_v42  ;;  %v67_v2 = vld [vmem:[%s1358_s0] sm:$0xff]  ;;  %v346_v3 = vld [vmem:[#allocation4 + $0x170] sm:$0xff]  ;;  %v441_v6 = vld [vmem:[#allocation4 + $0x468] sm:$0xff] }
  0x3f   :  { %175 = vmatpush1.msra.mxu0 %v88_v43  ;;  %246 = vmatpush1.msra.mxu1 %v90_v44  ;;  %v442_v4 = vld [vmem:[#allocation4 + $0x470] sm:$0xff]  ;;  %v343_v7 = vld [vmem:[#allocation4 + $0x158] sm:$0xff]  ;;  %v340_v11 = vld [vmem:[#allocation4 + $0x140] sm:$0xff] }
  0x40   :  { %176 = vmatprep.subr.mxu0 %v85_v45  ;;  %247 = vmatprep.subr.mxu1 %v87_v46  ;;  %v439_v8 = vld [vmem:[#allocation4 + $0x458] sm:$0xff]  ;;  %v342_v9 = vld [vmem:[#allocation4 + $0x150] sm:$0xff]  ;;  %v436_v12 = vld [vmem:[#allocation4 + $0x440] sm:$0xff] }
  0x41   :  { %177 = vmatpush1.msra.mxu0 %v84_v47  ;;  %248 = vmatpush1.msra.mxu1 %v86_v48  ;;  %v438_v10 = vld [vmem:[#allocation4 + $0x450] sm:$0xff]  ;;  %v339_v13 = vld [vmem:[#allocation4 + $0x138] sm:$0xff]  ;;  %v337_v15 = vld [vmem:[#allocation4 + $0x128] sm:$0xff] }
  0x42   :  { %178 = vmatprep.subr.mxu0 %v81_v49  ;;  %249 = vmatprep.subr.mxu1 %v83_v50  ;;  %v435_v14 = vld [vmem:[#allocation4 + $0x438] sm:$0xff]  ;;  %v433_v16 = vld [vmem:[#allocation4 + $0x428] sm:$0xff]  ;;  %v336_v17 = vld [vmem:[#allocation4 + $0x120] sm:$0xff] }
  0x43   :  { %179 = vmatpush1.msra.mxu0 %v80_v51  ;;  %250 = vmatpush1.msra.mxu1 %v82_v52  ;;  %v432_v18 = vld [vmem:[#allocation4 + $0x420] sm:$0xff]  ;;  %v334_v19 = vld [vmem:[#allocation4 + $0x110] sm:$0xff]  ;;  %v333_v21 = vld [vmem:[#allocation4 + $0x108] sm:$0xff] }
  0x44   :  { %180 = vmatprep.subr.mxu0 %v77_v53  ;;  %251 = vmatprep.subr.mxu1 %v79_v54  ;;  %v430_v20 = vld [vmem:[#allocation4 + $0x410] sm:$0xff]  ;;  %v429_v22 = vld [vmem:[#allocation4 + $0x408] sm:$0xff]  ;;  %v331_v23 = vld [vmem:[#allocation4 + $0xf8] sm:$0xff] }
  0x45   :  { %181 = vmatpush1.msra.mxu0 %v76_v55  ;;  %252 = vmatpush1.msra.mxu1 %v78_v56  ;;  %v427_v24 = vld [vmem:[#allocation4 + $0x3f8] sm:$0xff]  ;;  %v330_v25 = vld [vmem:[#allocation4 + $0xf0] sm:$0xff]  ;;  %v328_v27 = vld [vmem:[#allocation4 + $0xe0] sm:$0xff] }
  0x46   :  { %182 = vmatprep.subr.mxu0 %v73_v57  ;;  %253 = vmatprep.subr.mxu1 %v75_v58  ;;  %v426_v26 = vld [vmem:[#allocation4 + $0x3f0] sm:$0xff]  ;;  %v424_v28 = vld [vmem:[#allocation4 + $0x3e0] sm:$0xff]  ;;  %v327_v29 = vld [vmem:[#allocation4 + $0xd8] sm:$0xff] }
  0x47   :  { %183 = vmatpush1.msra.mxu0 %v72_v59  ;;  %254 = vmatpush1.msra.mxu1 %v74_v60  ;;  %v423_v30 = vld [vmem:[#allocation4 + $0x3d8] sm:$0xff]  ;;  %v325_v31 = vld [vmem:[#allocation4 + $0xc8] sm:$0xff]  ;;  %v324_v33 = vld [vmem:[#allocation4 + $0xc0] sm:$0xff] }
  0x48   :  { %184 = vmatprep.subr.mxu0 %v69_v61  ;;  %255 = vmatprep.subr.mxu1 %v71_v62  ;;  %v421_v32 = vld [vmem:[#allocation4 + $0x3c8] sm:$0xff]  ;;  %v420_v34 = vld [vmem:[#allocation4 + $0x3c0] sm:$0xff]  ;;  %v322_v35 = vld [vmem:[#allocation4 + $0xb0] sm:$0xff] }
  0x49   :  { %185 = vmatpush1.msra.mxu0 %v68_v63  ;;  %256 = vmatpush1.msra.mxu1 %v70_v1  ;;  %v418_v36 = vld [vmem:[#allocation4 + $0x3b0] sm:$0xff]  ;;  %v321_v37 = vld [vmem:[#allocation4 + $0xa8] sm:$0xff]  ;;  %v319_v39 = vld [vmem:[#allocation4 + $0x98] sm:$0xff] }
  0x4a   :  { %219 = vmatmul.mubr.f32.vlgmr.msra.gmra.mxu0 %v67_v2  ;;  %290 = vmatmul.mubr.f32.vlgmr.msra.gmra.mxu1 %v67_v2  ;;  %v417_v38 = vld [vmem:[#allocation4 + $0x3a8] sm:$0xff]  ;;  %v415_v40 = vld [vmem:[#allocation4 + $0x398] sm:$0xff]  ;;  %v318_v41 = vld [vmem:[#allocation4 + $0x90] sm:$0xff] }
  0x4b   :  { %509 = vmatprep.subr.mxu0 %v346_v3  ;;  %580 = vmatprep.subr.mxu1 %v442_v4  ;;  %v414_v42 = vld [vmem:[#allocation4 + $0x390] sm:$0xff]  ;;  %v316_v43 = vld [vmem:[#allocation4 + $0x80] sm:$0xff]  ;;  %v315_v45 = vld [vmem:[#allocation4 + $0x78] sm:$0xff] }
  0x4c   :  { %510 = vmatpush1.msra.mxu0 %v345_v5  ;;  %581 = vmatpush1.msra.mxu1 %v441_v6  ;;  %v412_v44 = vld [vmem:[#allocation4 + $0x380] sm:$0xff]  ;;  %v411_v46 = vld [vmem:[#allocation4 + $0x378] sm:$0xff]  ;;  %v313_v47 = vld [vmem:[#allocation4 + $0x68] sm:$0xff] }
  0x4d   :  { %511 = vmatprep.subr.mxu0 %v343_v7  ;;  %582 = vmatprep.subr.mxu1 %v439_v8  ;;  %v409_v48 = vld [vmem:[#allocation4 + $0x368] sm:$0xff]  ;;  %v312_v49 = vld [vmem:[#allocation4 + $0x60] sm:$0xff]  ;;  %v310_v51 = vld [vmem:[#allocation4 + $0x50] sm:$0xff] }
  0x4e   :  { %512 = vmatpush1.msra.mxu0 %v342_v9  ;;  %583 = vmatpush1.msra.mxu1 %v438_v10  ;;  %v408_v50 = vld [vmem:[#allocation4 + $0x360] sm:$0xff]  ;;  %v406_v52 = vld [vmem:[#allocation4 + $0x350] sm:$0xff]  ;;  %v309_v53 = vld [vmem:[#allocation4 + $0x48] sm:$0xff] }
  0x4f   :  { %513 = vmatprep.subr.mxu0 %v340_v11  ;;  %584 = vmatprep.subr.mxu1 %v436_v12  ;;  %v405_v54 = vld [vmem:[#allocation4 + $0x348] sm:$0xff]  ;;  %v307_v55 = vld [vmem:[#allocation4 + $0x38] sm:$0xff]  ;;  %v306_v57 = vld [vmem:[#allocation4 + $0x30] sm:$0xff] }
  0x50   :  { %514 = vmatpush1.msra.mxu0 %v339_v13  ;;  %585 = vmatpush1.msra.mxu1 %v435_v14  ;;  %v403_v56 = vld [vmem:[#allocation4 + $0x338] sm:$0xff]  ;;  %v402_v58 = vld [vmem:[#allocation4 + $0x330] sm:$0xff]  ;;  %v304_v59 = vld [vmem:[#allocation4 + $0x20] sm:$0xff] }
  0x51   :  { %515 = vmatprep.subr.mxu0 %v337_v15  ;;  %586 = vmatprep.subr.mxu1 %v433_v16  ;;  %v400_v60 = vld [vmem:[#allocation4 + $0x320] sm:$0xff]  ;;  %v303_v61 = vld [vmem:[#allocation4 + $0x18] sm:$0xff]  ;;  %v301_v63 = vld [vmem:[#allocation4 + $0x8] sm:$0xff] }
  0x52   :  { %516 = vmatpush1.msra.mxu0 %v336_v17  ;;  %587 = vmatpush1.msra.mxu1 %v432_v18  ;;  %v399_v62 = vld [vmem:[#allocation4 + $0x318] sm:$0xff]  ;;  %v397_v1 = vld [vmem:[#allocation4 + $0x308] sm:$0xff]  ;;  %v300_v2 = vld [vmem:[#allocation4] sm:$0xff] }
  0x53   :  { %517 = vmatprep.subr.mxu0 %v334_v19  ;;  %588 = vmatprep.subr.mxu1 %v430_v20  ;;  %v396_v3 = vld [vmem:[#allocation4 + $0x300] sm:$0xff]  ;;  %v394_v4 = vld [vmem:[#allocation4 + $0x2f0] sm:$0xff]  ;;  %v393_v6 = vld [vmem:[#allocation4 + $0x2e8] sm:$0xff] }
  0x54   :  { %518 = vmatpush1.msra.mxu0 %v333_v21  ;;  %589 = vmatpush1.msra.mxu1 %v429_v22  ;;  %v490_v5 = vld [vmem:[#allocation4 + $0x5f0] sm:$0xff]  ;;  %v489_v7 = vld [vmem:[#allocation4 + $0x5e8] sm:$0xff]  ;;  %v391_v8 = vld [vmem:[#allocation4 + $0x2d8] sm:$0xff] }
  0x55   :  { %519 = vmatprep.subr.mxu0 %v331_v23  ;;  %590 = vmatprep.subr.mxu1 %v427_v24  ;;  %v487_v9 = vld [vmem:[#allocation4 + $0x5d8] sm:$0xff]  ;;  %v390_v10 = vld [vmem:[#allocation4 + $0x2d0] sm:$0xff]  ;;  %v388_v12 = vld [vmem:[#allocation4 + $0x2c0] sm:$0xff] }
  0x56   :  { %520 = vmatpush1.msra.mxu0 %v330_v25  ;;  %591 = vmatpush1.msra.mxu1 %v426_v26  ;;  %v486_v11 = vld [vmem:[#allocation4 + $0x5d0] sm:$0xff]  ;;  %v484_v13 = vld [vmem:[#allocation4 + $0x5c0] sm:$0xff]  ;;  %v387_v14 = vld [vmem:[#allocation4 + $0x2b8] sm:$0xff] }
  0x57   :  { %521 = vmatprep.subr.mxu0 %v328_v27  ;;  %592 = vmatprep.subr.mxu1 %v424_v28  ;;  %v483_v15 = vld [vmem:[#allocation4 + $0x5b8] sm:$0xff]  ;;  %v385_v16 = vld [vmem:[#allocation4 + $0x2a8] sm:$0xff]  ;;  %v384_v18 = vld [vmem:[#allocation4 + $0x2a0] sm:$0xff] }
  0x58   :  { %522 = vmatpush1.msra.mxu0 %v327_v29  ;;  %593 = vmatpush1.msra.mxu1 %v423_v30  ;;  %v481_v17 = vld [vmem:[#allocation4 + $0x5a8] sm:$0xff]  ;;  %v480_v19 = vld [vmem:[#allocation4 + $0x5a0] sm:$0xff]  ;;  %v382_v20 = vld [vmem:[#allocation4 + $0x290] sm:$0xff] }
  0x59   :  { %523 = vmatprep.subr.mxu0 %v325_v31  ;;  %594 = vmatprep.subr.mxu1 %v421_v32  ;;  %v478_v21 = vld [vmem:[#allocation4 + $0x590] sm:$0xff]  ;;  %v381_v22 = vld [vmem:[#allocation4 + $0x288] sm:$0xff]  ;;  %v379_v24 = vld [vmem:[#allocation4 + $0x278] sm:$0xff] }
  0x5a   :  { %524 = vmatpush1.msra.mxu0 %v324_v33  ;;  %595 = vmatpush1.msra.mxu1 %v420_v34  ;;  %v477_v23 = vld [vmem:[#allocation4 + $0x588] sm:$0xff]  ;;  %v475_v25 = vld [vmem:[#allocation4 + $0x578] sm:$0xff]  ;;  %v378_v26 = vld [vmem:[#allocation4 + $0x270] sm:$0xff] }
  0x5b   :  { %525 = vmatprep.subr.mxu0 %v322_v35  ;;  %596 = vmatprep.subr.mxu1 %v418_v36  ;;  %v474_v27 = vld [vmem:[#allocation4 + $0x570] sm:$0xff]  ;;  %v376_v28 = vld [vmem:[#allocation4 + $0x260] sm:$0xff]  ;;  %v375_v30 = vld [vmem:[#allocation4 + $0x258] sm:$0xff] }
  0x5c   :  { %526 = vmatpush1.msra.mxu0 %v321_v37  ;;  %597 = vmatpush1.msra.mxu1 %v417_v38  ;;  %v472_v29 = vld [vmem:[#allocation4 + $0x560] sm:$0xff]  ;;  %v471_v31 = vld [vmem:[#allocation4 + $0x558] sm:$0xff]  ;;  %v373_v32 = vld [vmem:[#allocation4 + $0x248] sm:$0xff] }
  0x5d   :  { %527 = vmatprep.subr.mxu0 %v319_v39  ;;  %598 = vmatprep.subr.mxu1 %v415_v40  ;;  %v469_v33 = vld [vmem:[#allocation4 + $0x548] sm:$0xff]  ;;  %v372_v34 = vld [vmem:[#allocation4 + $0x240] sm:$0xff]  ;;  %v370_v36 = vld [vmem:[#allocation4 + $0x230] sm:$0xff] }
  0x5e   :  { %528 = vmatpush1.msra.mxu0 %v318_v41  ;;  %599 = vmatpush1.msra.mxu1 %v414_v42  ;;  %v468_v35 = vld [vmem:[#allocation4 + $0x540] sm:$0xff]  ;;  %v466_v37 = vld [vmem:[#allocation4 + $0x530] sm:$0xff]  ;;  %v369_v38 = vld [vmem:[#allocation4 + $0x228] sm:$0xff] }
  0x5f   :  { %529 = vmatprep.subr.mxu0 %v316_v43  ;;  %600 = vmatprep.subr.mxu1 %v412_v44  ;;  %v465_v39 = vld [vmem:[#allocation4 + $0x528] sm:$0xff]  ;;  %v367_v40 = vld [vmem:[#allocation4 + $0x218] sm:$0xff]  ;;  %v366_v42 = vld [vmem:[#allocation4 + $0x210] sm:$0xff] }
  0x60   :  { %530 = vmatpush1.msra.mxu0 %v315_v45  ;;  %601 = vmatpush1.msra.mxu1 %v411_v46  ;;  %v463_v41 = vld [vmem:[#allocation4 + $0x518] sm:$0xff]  ;;  %v462_v43 = vld [vmem:[#allocation4 + $0x510] sm:$0xff]  ;;  %v364_v44 = vld [vmem:[#allocation4 + $0x200] sm:$0xff] }
  0x61   :  { %531 = vmatprep.subr.mxu0 %v313_v47  ;;  %602 = vmatprep.subr.mxu1 %v409_v48  ;;  %v460_v45 = vld [vmem:[#allocation4 + $0x500] sm:$0xff]  ;;  %v363_v46 = vld [vmem:[#allocation4 + $0x1f8] sm:$0xff]  ;;  %v361_v48 = vld [vmem:[#allocation4 + $0x1e8] sm:$0xff] }
  0x62   :  { %532 = vmatpush1.msra.mxu0 %v312_v49  ;;  %603 = vmatpush1.msra.mxu1 %v408_v50  ;;  %v459_v47 = vld [vmem:[#allocation4 + $0x4f8] sm:$0xff]  ;;  %v457_v49 = vld [vmem:[#allocation4 + $0x4e8] sm:$0xff]  ;;  %v360_v50 = vld [vmem:[#allocation4 + $0x1e0] sm:$0xff] }
  0x63   :  { %533 = vmatprep.subr.mxu0 %v310_v51  ;;  %604 = vmatprep.subr.mxu1 %v406_v52  ;;  %v456_v51 = vld [vmem:[#allocation4 + $0x4e0] sm:$0xff]  ;;  %v358_v52 = vld [vmem:[#allocation4 + $0x1d0] sm:$0xff] }
  0x64   :  { %534 = vmatpush1.msra.mxu0 %v309_v53  ;;  %605 = vmatpush1.msra.mxu1 %v405_v54  ;;  %v454_v53 = vld [vmem:[#allocation4 + $0x4d0] sm:$0xff]  ;;  %v357_v54 = vld [vmem:[#allocation4 + $0x1c8] sm:$0xff] }
  0x65   :  { %535 = vmatprep.subr.mxu0 %v307_v55  ;;  %606 = vmatprep.subr.mxu1 %v403_v56  ;;  %v453_v55 = vld [vmem:[#allocation4 + $0x4c8] sm:$0xff]  ;;  %v355_v56 = vld [vmem:[#allocation4 + $0x1b8] sm:$0xff] }
  0x66   :  { %536 = vmatpush1.msra.mxu0 %v306_v57  ;;  %607 = vmatpush1.msra.mxu1 %v402_v58  ;;  %v451_v57 = vld [vmem:[#allocation4 + $0x4b8] sm:$0xff]  ;;  %v354_v58 = vld [vmem:[#allocation4 + $0x1b0] sm:$0xff] }
  0x67   :  { %537 = vmatprep.subr.mxu0 %v304_v59  ;;  %608 = vmatprep.subr.mxu1 %v400_v60  ;;  %v450_v59 = vld [vmem:[#allocation4 + $0x4b0] sm:$0xff]  ;;  %v352_v60 = vld [vmem:[#allocation4 + $0x1a0] sm:$0xff] }
  0x68   :  { %538 = vmatpush1.msra.mxu0 %v303_v61  ;;  %609 = vmatpush1.msra.mxu1 %v399_v62  ;;  %v448_v61 = vld [vmem:[#allocation4 + $0x4a0] sm:$0xff]  ;;  %v351_v62 = vld [vmem:[#allocation4 + $0x198] sm:$0xff] }
  0x69   :  { %539 = vmatprep.subr.mxu0 %v301_v63  ;;  %610 = vmatprep.subr.mxu1 %v397_v1  ;;  %v447_v63 = vld [vmem:[#allocation4 + $0x498] sm:$0xff]  ;;  %v349_v1 = vld [vmem:[#allocation4 + $0x188] sm:$0xff] }
  0x6a   :  { %540 = vmatpush1.msra.mxu0 %v300_v2  ;;  %611 = vmatpush1.msra.mxu1 %v396_v3  ;;  %v445_v2 = vld [vmem:[#allocation4 + $0x488] sm:$0xff]  ;;  %v348_v3 = vld [vmem:[#allocation4 + $0x180] sm:$0xff] }
  0x6b   :  { %541 = vmatprep.subr.mxu0 %v394_v4  ;;  %612 = vmatprep.subr.mxu1 %v490_v5  ;;  %v444_v4 = vld [vmem:[#allocation4 + $0x480] sm:$0xff]  ;;  %v395_v5 = vld [vmem:[#allocation4 + $0x2f8] sm:$0xff] }
  0x6c   :  { %542 = vmatpush2.msra.mxu0 %v393_v6  ;;  %613 = vmatpush2.msra.mxu1 %v489_v7  ;;  %v491_v6 = vld [vmem:[#allocation4 + $0x5f8] sm:$0xff]  ;;  %v134_v7 = vlaneseq }
  0x6d   :  { %543 = vmatprep.subr.mxu0 %v391_v8  ;;  %614 = vmatprep.subr.mxu1 %v487_v9 }
  0x6e   :  { %544 = vmatpush2.msra.mxu0 %v390_v10  ;;  %615 = vmatpush2.msra.mxu1 %v486_v11  ;;  %v1297_v8 = vshrl.u32 %v134_v7, 7  ;;  %v132_v11 = vld [vmem:[%s1360_s2] sm:$0xf]  ;;  %v317_v7 = vld [vmem:[#allocation4 + $0x88] sm:$0xff] }
  0x6f   :  { %545 = vmatprep.subr.mxu0 %v388_v12  ;;  %616 = vmatprep.subr.mxu1 %v484_v13 }
  0x70   :  { %546 = vmatpush2.msra.mxu0 %v387_v14  ;;  %617 = vmatpush2.msra.mxu1 %v483_v15  ;;  %v144_v9 = vsub.s32 2, %v1297_v8  ;;  %v136_v10 = vsub.s32 0, %v1297_v8  ;;  %v140_v12 = vsub.s32 1, %v1297_v8  ;;  %v148_v13 = vsub.s32 3, %v1297_v8 }
  0x71   :  { %547 = vmatprep.subr.mxu0 %v385_v16  ;;  %618 = vmatprep.subr.mxu1 %v481_v17 }
  0x72   :  { %548 = vmatpush2.msra.mxu0 %v384_v18  ;;  %619 = vmatpush2.msra.mxu1 %v480_v19  ;;  %v145_v14 = vrot.slane %v132_v11, %v144_v9  ;;  %v137_v15 = vrot.slane %v132_v11, %v136_v10  ;;  %v141_v16 = vrot.slane %v132_v11, %v140_v12 }
  0x73   :  { %549 = vmatprep.subr.mxu0 %v382_v20  ;;  %620 = vmatprep.subr.mxu1 %v478_v21  ;;  %v149_v17 = vrot.slane %v132_v11, %v148_v13  ;;  %v413_v11 = vld [vmem:[#allocation4 + $0x388] sm:$0xff]  ;;  %v362_v13 = vld [vmem:[#allocation4 + $0x1f0] sm:$0xff] }
  0x74   :  { %550 = vmatpush2.msra.mxu0 %v381_v22  ;;  %621 = vmatpush2.msra.mxu1 %v477_v23 }
  0x75   :  { %551 = vmatprep.subr.mxu0 %v379_v24  ;;  %622 = vmatprep.subr.mxu1 %v475_v25 }
  0x76   :  { %552 = vmatpush2.msra.mxu0 %v378_v26  ;;  %623 = vmatpush2.msra.mxu1 %v474_v27 }
  0x77   :  { %553 = vmatprep.subr.mxu0 %v376_v28  ;;  %624 = vmatprep.subr.mxu1 %v472_v29 }
  0x78   :  { %554 = vmatpush2.msra.mxu0 %v375_v30  ;;  %625 = vmatpush2.msra.mxu1 %v471_v31  ;;  %v347_v30 = vld [vmem:[#allocation4 + $0x178] sm:$0xff] }
  0x79   :  { %555 = vmatprep.subr.mxu0 %v373_v32  ;;  %626 = vmatprep.subr.mxu1 %v469_v33  ;;  %v443_v31 = vld [vmem:[#allocation4 + $0x478] sm:$0xff]  ;;  %v392_v32 = vld [vmem:[#allocation4 + $0x2e0] sm:$0xff] }
  0x7a   :  { %556 = vmatpush2.msra.mxu0 %v372_v34  ;;  %627 = vmatpush2.msra.mxu1 %v468_v35  ;;  %v488_v33 = vld [vmem:[#allocation4 + $0x5e0] sm:$0xff] }
  0x7b   :  { %557 = vmatprep.subr.mxu0 %v370_v36  ;;  %628 = vmatprep.subr.mxu1 %v466_v37  ;;  %v344_v34 = vld [vmem:[#allocation4 + $0x160] sm:$0xff]  ;;  %v389_v36 = vld [vmem:[#allocation4 + $0x2c8] sm:$0xff] }
  0x7c   :  { %558 = vmatpush2.msra.mxu0 %v369_v38  ;;  %629 = vmatpush2.msra.mxu1 %v465_v39  ;;  %v440_v35 = vld [vmem:[#allocation4 + $0x460] sm:$0xff]  ;;  %v485_v37 = vld [vmem:[#allocation4 + $0x5c8] sm:$0xff] }
  0x7d   :  { %559 = vmatprep.subr.mxu0 %v367_v40  ;;  %630 = vmatprep.subr.mxu1 %v463_v41  ;;  %v341_v38 = vld [vmem:[#allocation4 + $0x148] sm:$0xff]  ;;  %v386_v40 = vld [vmem:[#allocation4 + $0x2b0] sm:$0xff] }
  0x7e   :  { %560 = vmatpush2.msra.mxu0 %v366_v42  ;;  %631 = vmatpush2.msra.mxu1 %v462_v43  ;;  %v437_v39 = vld [vmem:[#allocation4 + $0x448] sm:$0xff]  ;;  %v482_v41 = vld [vmem:[#allocation4 + $0x5b0] sm:$0xff] }
  0x7f   :  { %561 = vmatprep.subr.mxu0 %v364_v44  ;;  %632 = vmatprep.subr.mxu1 %v460_v45  ;;  %v338_v42 = vld [vmem:[#allocation4 + $0x130] sm:$0xff]  ;;  %v383_v44 = vld [vmem:[#allocation4 + $0x298] sm:$0xff] }
  0x80   :  { %562 = vmatpush2.msra.mxu0 %v363_v46  ;;  %633 = vmatpush2.msra.mxu1 %v459_v47  ;;  %v434_v43 = vld [vmem:[#allocation4 + $0x430] sm:$0xff]  ;;  %v479_v45 = vld [vmem:[#allocation4 + $0x598] sm:$0xff] }
  0x81   :  { %563 = vmatprep.subr.mxu0 %v361_v48  ;;  %634 = vmatprep.subr.mxu1 %v457_v49  ;;  %v335_v46 = vld [vmem:[#allocation4 + $0x118] sm:$0xff]  ;;  %v380_v48 = vld [vmem:[#allocation4 + $0x280] sm:$0xff] }
  0x82   :  { %564 = vmatpush2.msra.mxu0 %v360_v50  ;;  %635 = vmatpush2.msra.mxu1 %v456_v51  ;;  %v431_v47 = vld [vmem:[#allocation4 + $0x418] sm:$0xff]  ;;  %v476_v49 = vld [vmem:[#allocation4 + $0x580] sm:$0xff] }
  0x83   :  { %565 = vmatprep.subr.mxu0 %v358_v52  ;;  %636 = vmatprep.subr.mxu1 %v454_v53  ;;  %v332_v50 = vld [vmem:[#allocation4 + $0x100] sm:$0xff]  ;;  %v377_v52 = vld [vmem:[#allocation4 + $0x268] sm:$0xff] }
  0x84   :  { %566 = vmatpush2.msra.mxu0 %v357_v54  ;;  %637 = vmatpush2.msra.mxu1 %v453_v55  ;;  %v428_v51 = vld [vmem:[#allocation4 + $0x400] sm:$0xff]  ;;  %v473_v53 = vld [vmem:[#allocation4 + $0x568] sm:$0xff] }
  0x85   :  { %567 = vmatprep.subr.mxu0 %v355_v56  ;;  %638 = vmatprep.subr.mxu1 %v451_v57  ;;  %v329_v54 = vld [vmem:[#allocation4 + $0xe8] sm:$0xff]  ;;  %v374_v56 = vld [vmem:[#allocation4 + $0x250] sm:$0xff] }
  0x86   :  { %568 = vmatpush2.msra.mxu0 %v354_v58  ;;  %639 = vmatpush2.msra.mxu1 %v450_v59  ;;  %v425_v55 = vld [vmem:[#allocation4 + $0x3e8] sm:$0xff]  ;;  %v470_v57 = vld [vmem:[#allocation4 + $0x550] sm:$0xff] }
  0x87   :  { %569 = vmatprep.subr.mxu0 %v352_v60  ;;  %640 = vmatprep.subr.mxu1 %v448_v61  ;;  %v326_v58 = vld [vmem:[#allocation4 + $0xd0] sm:$0xff]  ;;  %v371_v60 = vld [vmem:[#allocation4 + $0x238] sm:$0xff] }
  0x88   :  { %570 = vmatpush2.msra.mxu0 %v351_v62  ;;  %641 = vmatpush2.msra.mxu1 %v447_v63  ;;  %v422_v59 = vld [vmem:[#allocation4 + $0x3d0] sm:$0xff]  ;;  %v467_v61 = vld [vmem:[#allocation4 + $0x538] sm:$0xff] }
  0x89   :  { %571 = vmatprep.subr.mxu0 %v349_v1  ;;  %642 = vmatprep.subr.mxu1 %v445_v2  ;;  %v323_v62 = vld [vmem:[#allocation4 + $0xb8] sm:$0xff]  ;;  %v368_v1 = vld [vmem:[#allocation4 + $0x220] sm:$0xff] }
  0x8a   :  { %572 = vmatpush2.msra.mxu0 %v348_v3  ;;  %643 = vmatpush2.msra.mxu1 %v444_v4  ;;  %v419_v63 = vld [vmem:[#allocation4 + $0x3b8] sm:$0xff]  ;;  %v464_v2 = vld [vmem:[#allocation4 + $0x520] sm:$0xff] }
  0x8b   :  { %998 = vmatprep.subr.mxu0 %v395_v5  ;;  %1033 = vmatprep.subr.mxu1 %v491_v6  ;;  %v320_v3 = vld [vmem:[#allocation4 + $0xa0] sm:$0xff]  ;;  %v365_v5 = vld [vmem:[#allocation4 + $0x208] sm:$0xff] }
  0x8c   :  { %v416_v4 = vld [vmem:[#allocation4 + $0x3a0] sm:$0xff]  ;;  %v461_v6 = vld [vmem:[#allocation4 + $0x508] sm:$0xff] }
 0x10a   :  { %v220_v18 = vpop.f32.mrf.mxu0  ;;  %v291_v19 = vpop.f32.mrf.mxu1 }
 0x10b   :  { %v1312_v20 = vadd.f32 %v291_v19, %v145_v14  ;;  %v1314_v21 = vadd.f32 %v220_v18, %v137_v15  ;;  %v458_v14 = vld [vmem:[#allocation4 + $0x4f0] sm:$0xff]  ;;  %v455_v18 = vld [vmem:[#allocation4 + $0x4d8] sm:$0xff] }
 0x10c   :  { %v222_v22 = vpop.f32.mrf.mxu0  ;;  %v293_v23 = vpop.f32.mrf.mxu1  ;;  %v314_v15 = vld [vmem:[#allocation4 + $0x70] sm:$0xff]  ;;  %v311_v19 = vld [vmem:[#allocation4 + $0x58] sm:$0xff] }
 0x10d   :  { %v223_v24 = vadd.f32 %v222_v22, %v141_v16  ;;  %v294_v25 = vadd.f32 %v293_v23, %v149_v17  ;;  %v298_v26 = vmax.f32 %v1312_v20, 0.0  ;;  %v296_v29 = vmax.f32 %v1314_v21, 0.0  ;;  %v410_v16 = vld [vmem:[#allocation4 + $0x370] sm:$0xff]  ;;  %v359_v17 = vld [vmem:[#allocation4 + $0x1d8] sm:$0xff]  ;;  %v356_v23 = vld [vmem:[#allocation4 + $0x1c0] sm:$0xff] }
 0x10e   :  { %v407_v22 = vld [vmem:[#allocation4 + $0x358] sm:$0xff]  ;;  %v820_v20 = vld [vmem:[#allocation6 + $0xd0] sm:$0xff] }
 0x10f   :  { %v297_v27 = vmax.f32 %v223_v24, 0.0  ;;  %v299_v28 = vmax.f32 %v294_v25, 0.0  ;;  %v452_v24 = vld [vmem:[#allocation4 + $0x4c0] sm:$0xff]  ;;  %v805_v21 = vld [vmem:[#allocation6 + $0x58] sm:$0xff] }
 0x110   :  { %v308_v25 = vld [vmem:[#allocation4 + $0x40] sm:$0xff] }
 0x111   :  { %573 = vmatprep.mubr.f32.mxu0 %v297_v27  ;;  %644 = vmatprep.mubr.f32.mxu1 %v299_v28 }
 0x112   :  { %574 = vmatmul.mubr.f32.vlgmr.msra.gmra.mxu0 %v296_v29  ;;  %645 = vmatmul.mubr.f32.vlgmr.msra.gmra.mxu1 %v298_v26 }
 0x113   :  { %999 = vmatpush3.msra.mxu0 %v347_v30  ;;  %1034 = vmatpush3.msra.mxu1 %v443_v31  ;;  %v449_v30 = vld [vmem:[#allocation4 + $0x4a8] sm:$0xff] }
 0x114   :  { %1000 = vmatprep.subr.mxu0 %v392_v32  ;;  %715 = vmatprep.mubr.f32.mxu0 %v297_v27  ;;  %v404_v27 = vld [vmem:[#allocation4 + $0x340] sm:$0xff]  ;;  %v305_v31 = vld [vmem:[#allocation4 + $0x28] sm:$0xff] }
 0x115   :  { %1035 = vmatprep.subr.mxu1 %v488_v33  ;;  %785 = vmatprep.mubr.f32.mxu1 %v299_v28  ;;  %v353_v28 = vld [vmem:[#allocation4 + $0x1a8] sm:$0xff]  ;;  %v350_v33 = vld [vmem:[#allocation4 + $0x190] sm:$0xff] }
 0x116   :  { %1001 = vmatpush3.msra.mxu0 %v344_v34  ;;  %1036 = vmatpush3.msra.mxu1 %v440_v35  ;;  %v401_v32 = vld [vmem:[#allocation4 + $0x328] sm:$0xff]  ;;  %v446_v34 = vld [vmem:[#allocation4 + $0x490] sm:$0xff] }
 0x117   :  { %1002 = vmatprep.subr.mxu0 %v389_v36  ;;  %1037 = vmatprep.subr.mxu1 %v485_v37  ;;  %v302_v35 = vld [vmem:[#allocation4 + $0x10] sm:$0xff]  ;;  %v825_v37 = vld [vmem:[#allocation6 + $0xf8] sm:$0xff] }
 0x118   :  { %1003 = vmatpush3.msra.mxu0 %v341_v38  ;;  %1038 = vmatpush3.msra.mxu1 %v437_v39  ;;  %v398_v36 = vld [vmem:[#allocation4 + $0x310] sm:$0xff]  ;;  %v809_v38 = vld [vmem:[#allocation6 + $0x78] sm:$0xff] }
 0x119   :  { %1004 = vmatprep.subr.mxu0 %v386_v40  ;;  %1039 = vmatprep.subr.mxu1 %v482_v41  ;;  %v824_v39 = vld [vmem:[#allocation6 + $0xf0] sm:$0xff]  ;;  %v823_v41 = vld [vmem:[#allocation6 + $0xe8] sm:$0xff] }
 0x11a   :  { %1005 = vmatpush3.msra.mxu0 %v338_v42  ;;  %1040 = vmatpush3.msra.mxu1 %v434_v43  ;;  %v808_v40 = vld [vmem:[#allocation6 + $0x70] sm:$0xff]  ;;  %v807_v42 = vld [vmem:[#allocation6 + $0x68] sm:$0xff]  ;;  %v822_v43 = vld [vmem:[#allocation6 + $0xe0] sm:$0xff] }
 0x11b   :  { %1006 = vmatprep.subr.mxu0 %v383_v44  ;;  %1041 = vmatprep.subr.mxu1 %v479_v45  ;;  %v806_v44 = vld [vmem:[#allocation6 + $0x60] sm:$0xff]  ;;  %v821_v45 = vld [vmem:[#allocation6 + $0xd8] sm:$0xff] }
 0x11c   :  { %1007 = vmatpush3.msra.mxu0 %v335_v46  ;;  %1042 = vmatpush3.msra.mxu1 %v431_v47  ;;  %v803_v46 = vld [vmem:[#allocation6 + $0x48] sm:$0xff]  ;;  %v818_v47 = vld [vmem:[#allocation6 + $0xc0] sm:$0xff] }
 0x11d   :  { %1008 = vmatprep.subr.mxu0 %v380_v48  ;;  %1043 = vmatprep.subr.mxu1 %v476_v49  ;;  %v802_v48 = vld [vmem:[#allocation6 + $0x40] sm:$0xff]  ;;  %v817_v49 = vld [vmem:[#allocation6 + $0xb8] sm:$0xff] }
 0x11e   :  { %1009 = vmatpush3.msra.mxu0 %v332_v50  ;;  %1044 = vmatpush3.msra.mxu1 %v428_v51  ;;  %v801_v50 = vld [vmem:[#allocation6 + $0x38] sm:$0xff]  ;;  %v816_v51 = vld [vmem:[#allocation6 + $0xb0] sm:$0xff] }
 0x11f   :  { %1010 = vmatprep.subr.mxu0 %v377_v52  ;;  %1045 = vmatprep.subr.mxu1 %v473_v53  ;;  %v800_v52 = vld [vmem:[#allocation6 + $0x30] sm:$0xff]  ;;  %v815_v53 = vld [vmem:[#allocation6 + $0xa8] sm:$0xff] }
 0x120   :  { %1011 = vmatpush3.msra.mxu0 %v329_v54  ;;  %1046 = vmatpush3.msra.mxu1 %v425_v55  ;;  %v799_v54 = vld [vmem:[#allocation6 + $0x28] sm:$0xff]  ;;  %v814_v55 = vld [vmem:[#allocation6 + $0xa0] sm:$0xff] }
 0x121   :  { %1012 = vmatprep.subr.mxu0 %v374_v56  ;;  %1047 = vmatprep.subr.mxu1 %v470_v57  ;;  %v798_v56 = vld [vmem:[#allocation6 + $0x20] sm:$0xff]  ;;  %v813_v57 = vld [vmem:[#allocation6 + $0x98] sm:$0xff] }
 0x122   :  { %1013 = vmatpush3.msra.mxu0 %v326_v58  ;;  %1048 = vmatpush3.msra.mxu1 %v422_v59  ;;  %v797_v58 = vld [vmem:[#allocation6 + $0x18] sm:$0xff]  ;;  %v812_v59 = vld [vmem:[#allocation6 + $0x90] sm:$0xff] }
 0x123   :  { %1014 = vmatprep.subr.mxu0 %v371_v60  ;;  %1049 = vmatprep.subr.mxu1 %v467_v61  ;;  %v796_v60 = vld [vmem:[#allocation6 + $0x10] sm:$0xff]  ;;  %v811_v61 = vld [vmem:[#allocation6 + $0x88] sm:$0xff] }
 0x124   :  { %1015 = vmatpush3.msra.mxu0 %v323_v62  ;;  %1050 = vmatpush3.msra.mxu1 %v419_v63  ;;  %v795_v62 = vld [vmem:[#allocation6 + $0x8] sm:$0xff]  ;;  %v810_v63 = vld [vmem:[#allocation6 + $0x80] sm:$0xff] }
 0x125   :  { %1016 = vmatprep.subr.mxu0 %v368_v1  ;;  %1051 = vmatprep.subr.mxu1 %v464_v2  ;;  %v794_v1 = vld [vmem:[#allocation6] sm:$0xff]  ;;  %v841_v2 = vld [vmem:[#allocation6 + $0x178] sm:$0xff] }
 0x126   :  { %1017 = vmatpush3.msra.mxu0 %v320_v3  ;;  %1052 = vmatpush3.msra.mxu1 %v416_v4  ;;  %v840_v3 = vld [vmem:[#allocation6 + $0x170] sm:$0xff]  ;;  %v839_v4 = vld [vmem:[#allocation6 + $0x168] sm:$0xff] }
 0x127   :  { %1018 = vmatprep.subr.mxu0 %v365_v5  ;;  %1053 = vmatprep.subr.mxu1 %v461_v6  ;;  %v838_v5 = vld [vmem:[#allocation6 + $0x160] sm:$0xff]  ;;  %v837_v6 = vld [vmem:[#allocation6 + $0x158] sm:$0xff] }
 0x128   :  { %1019 = vmatpush3.msra.mxu0 %v317_v7  ;;  %1054 = vmatpush3.msra.mxu1 %v413_v11  ;;  %v836_v7 = vld [vmem:[#allocation6 + $0x150] sm:$0xff]  ;;  %v835_v11 = vld [vmem:[#allocation6 + $0x148] sm:$0xff] }
 0x129   :  { %1020 = vmatprep.subr.mxu0 %v362_v13  ;;  %1055 = vmatprep.subr.mxu1 %v458_v14  ;;  %v834_v13 = vld [vmem:[#allocation6 + $0x140] sm:$0xff]  ;;  %v833_v14 = vld [vmem:[#allocation6 + $0x138] sm:$0xff] }
 0x12a   :  { %1021 = vmatpush3.msra.mxu0 %v314_v15  ;;  %1056 = vmatpush3.msra.mxu1 %v410_v16  ;;  %v832_v15 = vld [vmem:[#allocation6 + $0x130] sm:$0xff]  ;;  %v831_v16 = vld [vmem:[#allocation6 + $0x128] sm:$0xff] }
 0x12b   :  { %1022 = vmatprep.subr.mxu0 %v359_v17  ;;  %1057 = vmatprep.subr.mxu1 %v455_v18  ;;  %v830_v17 = vld [vmem:[#allocation6 + $0x120] sm:$0xff]  ;;  %v829_v18 = vld [vmem:[#allocation6 + $0x118] sm:$0xff] }
 0x12c   :  { %1023 = vmatpush3.msra.mxu0 %v311_v19  ;;  %1058 = vmatpush3.msra.mxu1 %v407_v22  ;;  %v828_v19 = vld [vmem:[#allocation6 + $0x110] sm:$0xff]  ;;  %v827_v22 = vld [vmem:[#allocation6 + $0x108] sm:$0xff] }
 0x12d   :  { %1024 = vmatprep.subr.mxu0 %v356_v23  ;;  %1059 = vmatprep.subr.mxu1 %v452_v24  ;;  %v826_v23 = vld [vmem:[#allocation6 + $0x100] sm:$0xff] }
 0x12e   :  { %1025 = vmatpush3.msra.mxu0 %v308_v25  ;;  %1060 = vmatpush3.msra.mxu1 %v404_v27  ;;  %v492_v24 = vld [vmem:[%s1362_s4] sm:$0x7] }
 0x12f   :  { %1026 = vmatprep.subr.mxu0 %v353_v28  ;;  %1061 = vmatprep.subr.mxu1 %v449_v30  ;;  %v497_v25 = vrot.slane %v492_v24, %v136_v10  ;;  %v501_v27 = vrot.slane %v492_v24, %v140_v12  ;;  %v505_v10 = vrot.slane %v492_v24, %v144_v9 }
 0x130   :  { %1027 = vmatpush3.msra.mxu0 %v305_v31  ;;  %1062 = vmatpush3.msra.mxu1 %v401_v32 }
 0x131   :  { %1028 = vmatprep.subr.mxu0 %v350_v33  ;;  %1063 = vmatprep.subr.mxu1 %v446_v34 }
 0x132   :  { %1029 = vmatpush3.msra.mxu0 %v302_v35  ;;  %1064 = vmatpush3.msra.mxu1 %v398_v36 }
 0x133   :  { %716 = vmatmul.mubr.f32.vlgmr.msra.gmra.mxu0 %v296_v29  ;;  %786 = vmatmul.mubr.f32.vlgmr.msra.gmra.mxu1 %v298_v26  ;;  %v804_v26 = vld [vmem:[#allocation6 + $0x50] sm:$0xff]  ;;  %v819_v29 = vld [vmem:[#allocation6 + $0xc8] sm:$0xff] }
 0x134   :  { %1068 = vmatprep.subr.mxu0 %v825_v37  ;;  %1120 = vmatprep.subr.mxu1 %v1241_v0 }
 0x135   :  { %1069 = vmatpush3.msra.mxu0 %v809_v38  ;;  %1121 = vmatpush3.msra.mxu1 %v841_v2 }
 0x136   :  { %1070 = vmatprep.subr.mxu0 %v824_v39  ;;  %1122 = vmatprep.subr.mxu1 %v1241_v0 }
 0x137   :  { %1071 = vmatpush3.msra.mxu0 %v808_v40  ;;  %1123 = vmatpush3.msra.mxu1 %v840_v3 }
 0x138   :  { %1072 = vmatprep.subr.mxu0 %v823_v41  ;;  %1124 = vmatprep.subr.mxu1 %v1241_v0 }
 0x139   :  { %1073 = vmatpush3.msra.mxu0 %v807_v42  ;;  %1125 = vmatpush3.msra.mxu1 %v839_v4 }
 0x13a   :  { %1074 = vmatprep.subr.mxu0 %v822_v43  ;;  %1126 = vmatprep.subr.mxu1 %v1241_v0 }
 0x13b   :  { %1075 = vmatpush3.msra.mxu0 %v806_v44  ;;  %1127 = vmatpush3.msra.mxu1 %v838_v5 }
 0x13c   :  { %1076 = vmatprep.subr.mxu0 %v821_v45  ;;  %1128 = vmatprep.subr.mxu1 %v1241_v0 }
 0x13d   :  { %1077 = vmatpush3.msra.mxu0 %v805_v21  ;;  %1129 = vmatpush3.msra.mxu1 %v837_v6 }
 0x13e   :  { %1078 = vmatprep.subr.mxu0 %v820_v20  ;;  %1130 = vmatprep.subr.mxu1 %v1241_v0 }
 0x13f   :  { %1079 = vmatpush3.msra.mxu0 %v804_v26  ;;  %1131 = vmatpush3.msra.mxu1 %v836_v7 }
 0x140   :  { %1080 = vmatprep.subr.mxu0 %v819_v29  ;;  %1132 = vmatprep.subr.mxu1 %v1241_v0  ;;  %v997_v29 = vld [vmem:[%s1364_s6] ss:$0 sm:$0xff] }
 0x141   :  { %1081 = vmatpush3.msra.mxu0 %v803_v46  ;;  %1133 = vmatpush3.msra.mxu1 %v835_v11 }
 0x142   :  { %1082 = vmatprep.subr.mxu0 %v818_v47  ;;  %1134 = vmatprep.subr.mxu1 %v1241_v0 }
 0x143   :  { %1083 = vmatpush3.msra.mxu0 %v802_v48  ;;  %1135 = vmatpush3.msra.mxu1 %v834_v13 }
 0x144   :  { %1084 = vmatprep.subr.mxu0 %v817_v49  ;;  %1136 = vmatprep.subr.mxu1 %v1241_v0 }
 0x145   :  { %1085 = vmatpush3.msra.mxu0 %v801_v50  ;;  %1137 = vmatpush3.msra.mxu1 %v833_v14 }
 0x146   :  { %1086 = vmatprep.subr.mxu0 %v816_v51  ;;  %1138 = vmatprep.subr.mxu1 %v1241_v0 }
 0x147   :  { %1087 = vmatpush3.msra.mxu0 %v800_v52  ;;  %1139 = vmatpush3.msra.mxu1 %v832_v15 }
 0x148   :  { %1088 = vmatprep.subr.mxu0 %v815_v53  ;;  %1140 = vmatprep.subr.mxu1 %v1241_v0 }
 0x149   :  { %1089 = vmatpush3.msra.mxu0 %v799_v54  ;;  %1141 = vmatpush3.msra.mxu1 %v831_v16 }
 0x14a   :  { %1090 = vmatprep.subr.mxu0 %v814_v55  ;;  %1142 = vmatprep.subr.mxu1 %v1241_v0 }
 0x14b   :  { %1091 = vmatpush3.msra.mxu0 %v798_v56  ;;  %1143 = vmatpush3.msra.mxu1 %v830_v17 }
 0x14c   :  { %1092 = vmatprep.subr.mxu0 %v813_v57  ;;  %1144 = vmatprep.subr.mxu1 %v1241_v0 }
 0x14d   :  { %1093 = vmatpush3.msra.mxu0 %v797_v58  ;;  %1145 = vmatpush3.msra.mxu1 %v829_v18 }
 0x14e   :  { %1094 = vmatprep.subr.mxu0 %v812_v59  ;;  %1146 = vmatprep.subr.mxu1 %v1241_v0 }
 0x14f   :  { %1095 = vmatpush3.msra.mxu0 %v796_v60  ;;  %1147 = vmatpush3.msra.mxu1 %v828_v19 }
 0x150   :  { %1096 = vmatprep.subr.mxu0 %v811_v61  ;;  %1148 = vmatprep.subr.mxu1 %v1241_v0 }
 0x151   :  { %1097 = vmatpush3.msra.mxu0 %v795_v62  ;;  %1149 = vmatpush3.msra.mxu1 %v827_v22 }
 0x152   :  { %1098 = vmatprep.subr.mxu0 %v810_v63  ;;  %1150 = vmatprep.subr.mxu1 %v1241_v0 }
 0x153   :  { %1099 = vmatpush3.msra.mxu0 %v794_v1  ;;  %1151 = vmatpush3.msra.mxu1 %v826_v23 }
 0x154   :  { %1152 = vmatprep.mubr.msk.f32.mxu1 %vm1242_vm0, %v1241_v0 }
 0x1d2   :  { %v575_v28 = vpop.f32.mrf.mxu0  ;;  %v646_v30 = vpop.f32.mrf.mxu1 }
 0x1d3   :  { %v576_v31 = vadd.f32 %v575_v28, %v497_v25 }
 0x1d4   :  { %v577_v32 = vpop.f32.mrf.mxu0  ;;  %v648_v35 = vpop.f32.mrf.mxu1 }
 0x1d5   :  { %v578_v33 = vadd.f32 %v577_v32, %v501_v27  ;;  %v647_v34 = vadd.f32 %v646_v30, %v576_v31 }
 0x1d7   :  { %v649_v36 = vadd.f32 %v648_v35, %v578_v33  ;;  %v791_v0 = vmax.f32 %v647_v34, 0.0 }
 0x1d9   :  { %v792_v37 = vmax.f32 %v649_v36, 0.0 }
 0x1db   :  { %913 = vmatprep.mubr.f32.mxu0 %v792_v37 }
 0x1dc   :  { %914 = vmatmul.mubr.f32.vlgmr.msra.gmra.mxu0 %v791_v0 }
 0x1f3   :  { %v1030_v38 = vpop.f32.mrf.mxu0  ;;  %v1065_v39 = vpop.f32.mrf.mxu1 }
 0x1f5   :  { %v1031_v40 = vpop.f32.mrf.mxu0  ;;  %v1066_v41 = vpop.f32.mrf.mxu1 }
 0x1f6   :  { %v1032_v12 = vadd.f32 %v1031_v40, %v1030_v38  ;;  %v1067_v43 = vadd.f32 %v1066_v41, %v1065_v39 }
 0x1f8   :  { %v718_v42 = vadd.f32 %v1032_v12, %v505_v10 }
 0x1fa   :  { %v788_v44 = vadd.f32 %v1067_v43, %v718_v42 }
 0x1fc   :  { %v793_v45 = vmax.f32 %v788_v44, 0.0 }
 0x1fe   :  { %1153 = vmatmul.mubr.f32.vlgmr.msra.gmra.mxu1 %v793_v45 }
 0x29c   :  { %v1100_v21 = vpop.f32.mrf.mxu0 }
 0x29e   :  { %v1101_v20 = vpop.f32.mrf.mxu0 }
 0x29f   :  { %v1102_v26 = vadd.f32 %v1101_v20, %v1100_v21 }
 0x2a1   :  { %v916_v46 = vadd.f32 %v1102_v26, %v997_v29 }
 0x2be   :  { %v985_v47 = vpop.f32.mrf.mxu1 }
 0x2bf   :  { %v986_v48 = vadd.f32 %v985_v47, %v916_v46 }
 0x2c0   :  { %v1154_v8 = vpop.f32.mrf.mxu1 }
 0x2c1   :  { %1166 = vtanh.f32 %v986_v48 }
 0x2ce   :  { %v1167_v9 = vpop.eup %1166 }
 0x2cf   :  { %990 = vst [vmem:[%s1365_s7] sm:$0xff] %v1167_v9 }
 0x2d0   :  { %995 = vsyncpa [#allocation3], 1 }
 0x2d1   :  { %996 = vsyncpa [#allocation5], 1 }

</bundles_post_ra>
